<compile_context>
chip_gen: v5e
topology: v5e:2x2
jax: 0.10.0
libtpu: 0.0.40
codegen_flags: <defaults>
</compile_context>

<pallas_src>
import jax
import jax.numpy as jnp
from jax.experimental import pallas as pl
from jax.experimental.pallas import tpu as pltpu

NEG_SLOPE = 0.01        # nn.LeakyReLU() default
PAD_BIAS = -1e30        # softmax pad-lane bias -> exp() underflows to exactly 0 in f32
H1, H2, H3 = 256, 128, 64
H3P = 128               # fc3 output padded to a lane-dense 128


def _round_up(n, m):
    return ((n + m - 1) // m) * m


def _leaky_relu(x):
    # For 0 < slope < 1, max(x, slope*x) == LeakyReLU(x): mul+max (2 VALU ops)
    # instead of cmp+select+mul (3 VALU ops).
    return jnp.maximum(x, NEG_SLOPE * x)


def lifestyle_nn_kernel(x_ref,
                        w1_ref, b1_ref,
                        w2_ref, b2_ref,
                        w3_ref, b3_ref,
                        w4_ref, b4_ref,
                        out_ref):
    # bf16 MXU operands, f32 accumulation / elementwise.
    x = x_ref[...].astype(jnp.bfloat16)

    # fc1 + LeakyReLU
    h = jnp.dot(x, w1_ref[...], preferred_element_type=jnp.float32) + b1_ref[...]
    h = _leaky_relu(h)

    # fc2 + LeakyReLU
    h = jnp.dot(h.astype(jnp.bfloat16), w2_ref[...],
                preferred_element_type=jnp.float32) + b2_ref[...]
    h = _leaky_relu(h)

    # fc3 + LeakyReLU (output padded 64->128; pad lanes are exactly 0).
    # Dropout(p=0.4) is identity in eval mode.
    h = jnp.dot(h.astype(jnp.bfloat16), w3_ref[...],
                preferred_element_type=jnp.float32) + b3_ref[...]
    h = _leaky_relu(h)

    # fc4 (class dim padded to 128 lanes; pad lanes carry -1e30 bias)
    logits = jnp.dot(h.astype(jnp.bfloat16), w4_ref[...],
                     preferred_element_type=jnp.float32) + b4_ref[...]

    # softmax over the (padded) class axis; pad lanes contribute exp(-huge) == 0.
    m = jnp.max(logits, axis=-1, keepdims=True)
    e = jnp.exp(logits - m)
    inv = pl.reciprocal(jnp.sum(e, axis=-1, keepdims=True), approx=True)
    out_ref[...] = (e * inv).astype(out_ref.dtype)   # bf16 store -> half the writeback bytes


def _pick_tile(B, batch_tile):
    """Batch tile: big enough to amortize the ~0.35us per-grid-step cost, but keep
    >=2 grid steps when the batch allows so v7x's 2 TensorCores both get work."""
    if B < 128:
        return _round_up(max(B, 1), 8)            # tiny / demo batches
    tile = min(batch_tile, _round_up(B, 128))
    while tile > 256 and pl.cdiv(B, tile) < 2:
        tile //= 2
    return tile


def _vmem_budget_bytes(tile, D, CP):
    """Conservative estimate of kernel VMEM use (double-buffered I/O + resident
    weights + f32/bf16 intermediates), with scheduler headroom."""
    f32, bf16 = 4, 2
    io = 2 * tile * D * f32 + 2 * tile * CP * bf16                   # x / out double buffers
    w = 2 * (D * H1 + H1 * H2 + H2 * H3P + H3P * CP) * bf16          # (double-buffered) weights
    b = 2 * (H1 + H2 + H3P + CP) * f32                               # biases
    inter = tile * (H1 + H2 + H3P + CP) * (f32 + bf16)               # f32 acts + bf16 casts
    return int(1.5 * (io + w + b + inter)) + (4 << 20)


def lifestyle_nn_forward(x, params, *, batch_tile=1024, trim=True):
    """x: (B, input_size) float32.
    params: w{i} of shape (in, out), b{i} of shape (1, out).
    batch_tile: 1024 is a good default for v6e/v7x; 512-1024 on v5e.
    trim=False returns the (Bp, 128) bf16 buffer directly (pad rows/lanes included),
    avoiding a separate HBM round-trip when the consumer can ignore pads."""
    B, D = x.shape
    C = params["w4"].shape[1]

    # --- optional feature-dim padding (only for large, unaligned input_size) -----
    if D > 128 and D % 128 != 0:
        Dp = _round_up(D, 128)
        x = jnp.pad(x, ((0, 0), (0, Dp - D)))
        w1_full = jnp.zeros((Dp, H1), jnp.float32).at[:D, :].set(params["w1"])
    else:
        Dp = D
        w1_full = params["w1"]

    # --- pad fc3 output 64 -> 128 (zero cols/bias; zero extra w4 input rows) -----
    w3p = jnp.zeros((H2, H3P), jnp.float32).at[:, :H3].set(params["w3"])
    b3p = jnp.zeros((1, H3P), jnp.float32).at[:, :H3].set(params["b3"])

    # --- pad the class dim to a lane-dense 128 multiple --------------------------
    CP = max(128, _round_up(C, 128))
    w4p = jnp.zeros((H3P, CP), jnp.float32).at[:H3, :C].set(params["w4"])
    b4p = jnp.full((1, CP), PAD_BIAS, jnp.float32).at[:, :C].set(params["b4"])

    # --- bf16 weights for the MXU; biases stay f32 --------------------------------
    w1 = w1_full.astype(jnp.bfloat16)
    w2 = params["w2"].astype(jnp.bfloat16)
    w3 = w3p.astype(jnp.bfloat16)
    w4 = w4p.astype(jnp.bfloat16)
    b1, b2, b3, b4 = params["b1"], params["b2"], b3p, b4p

    # --- batch tile, VMEM budget, batch padding -----------------------------------
    tile = _pick_tile(B, batch_tile)
    vmem_bytes = _vmem_budget_bytes(tile, Dp, CP)
    while vmem_bytes > (48 << 20) and tile > 128:     # stay well inside v7x's 64 MiB
        tile //= 2
        vmem_bytes = _vmem_budget_bytes(tile, Dp, CP)

    Bp = _round_up(B, tile)
    if Bp != B:
        x = jnp.pad(x, ((0, Bp - B), (0, 0)))

    def full_spec(shape):
        # constant block index -> weight/bias stays resident in VMEM across the grid
        return pl.BlockSpec(shape, lambda i: (0, 0))

    flops = 2 * Bp * (Dp * H1 + H1 * H2 + H2 * H3P + H3P * CP)
    bytes_accessed = (Bp * Dp * 4 + Bp * CP * 2
                      + (Dp * H1 + H1 * H2 + H2 * H3P + H3P * CP) * 2
                      + (H1 + H2 + H3P + CP) * 4)
    cost = pl.CostEstimate(flops=flops,
                           transcendentals=Bp * CP + Bp,
                           bytes_accessed=bytes_accessed)

    grid = (Bp // tile,)
    out = pl.pallas_call(
        lifestyle_nn_kernel,
        out_shape=jax.ShapeDtypeStruct((Bp, CP), jnp.bfloat16),
        grid_spec=pltpu.PrefetchScalarGridSpec(
            num_scalar_prefetch=0,
            grid=grid,
            in_specs=[
                pl.BlockSpec((tile, Dp), lambda i: (i, 0)),   # x tile
                full_spec(w1.shape), full_spec(b1.shape),
                full_spec(w2.shape), full_spec(b2.shape),
                full_spec(w3.shape), full_spec(b3.shape),
                full_spec(w4.shape), full_spec(b4.shape),
            ],
            out_specs=pl.BlockSpec((tile, CP), lambda i: (i, 0)),
        ),
        compiler_params=pltpu.CompilerParams(
            dimension_semantics=("parallel",),
            vmem_limit_bytes=int(min(vmem_bytes, 56 << 20)),
        ),
        cost_estimate=cost,
    )(x, w1, b1, w2, b2, w3, b3, w4, b4)

    if not trim:
        return out
    # Separate XLA slice (re-reads the padded buffer); pass trim=False and consume the
    # padded bf16 buffer directly when this matters for a mem-bound pipeline.
    return out[:B, :C]


def init_params(key, input_size, num_classes):
    """Deterministic synthetic init; weights stored as (in, out), biases as (1, out)."""
    sizes = [(input_size, H1), (H1, H2), (H2, H3), (H3, num_classes)]
    params = {}
    for idx, (fan_in, fan_out) in enumerate(sizes, start=1):
        key, kw, kb = jax.random.split(key, 3)
        bound = 1.0 / jnp.sqrt(fan_in)
        params[f"w{idx}"] = jax.random.uniform(
            kw, (fan_in, fan_out), jnp.float32, minval=-bound, maxval=bound)
        params[f"b{idx}"] = jax.random.uniform(
            kb, (1, fan_out), jnp.float32, minval=-bound, maxval=bound)
    return params


def reference_forward(x, params):
    h = x
    for idx in range(1, 4):
        h = h @ params[f"w{idx}"] + params[f"b{idx}"]
        h = jnp.where(h > 0, h, NEG_SLOPE * h)
    logits = h @ params["w4"] + params["b4"]
    return jax.nn.softmax(logits, axis=1)


if __name__ == "__main__":
    key = jax.random.PRNGKey(0)
    k_x, k_p = jax.random.split(key)

    B, INPUT_SIZE, NUM_CLASSES = 16, 32, 10
    x = jax.random.normal(k_x, (B, INPUT_SIZE), dtype=jnp.float32)
    params = init_params(k_p, INPUT_SIZE, NUM_CLASSES)

    out = lifestyle_nn_forward(x, params)
    out = jax.block_until_ready(out)
    out_f32 = out.astype(jnp.float32)

    ref = reference_forward(x, params)
    assert out.shape == (B, NUM_CLASSES)
    # bf16 matmuls + bf16 output + approx reciprocal -> relaxed tolerances vs f32 ref
    assert jnp.allclose(out_f32, ref, atol=3e-2, rtol=3e-2)
    assert jnp.allclose(jnp.sum(out_f32, axis=1), jnp.ones((B,)), atol=1e-2)

    print("KERNEL_OK")
</pallas_src>

<mosaic_0001>
module attributes {stable_mosaic.version = 11 : i64} {
  func.func @lifestyle_nn_kernel(%arg0: i32, %arg1: memref<16x32xf32, #tpu.memory_space<vmem>>, %arg2: memref<32x256xbf16, #tpu.memory_space<vmem>>, %arg3: memref<1x256xf32, #tpu.memory_space<vmem>>, %arg4: memref<256x128xbf16, #tpu.memory_space<vmem>>, %arg5: memref<1x128xf32, #tpu.memory_space<vmem>>, %arg6: memref<128x128xbf16, #tpu.memory_space<vmem>>, %arg7: memref<1x128xf32, #tpu.memory_space<vmem>>, %arg8: memref<128x128xbf16, #tpu.memory_space<vmem>>, %arg9: memref<1x128xf32, #tpu.memory_space<vmem>>, %arg10: memref<16x128xbf16, #tpu.memory_space<vmem>>) attributes {dimension_semantics = [#tpu.dimension_semantics<parallel>], iteration_bounds = array<i64: 1>, scalar_prefetch = 0 : i64, scratch_operands = 0 : i64, tpu.core_type = #tpu.core_type<tc>, window_params = [{transform_indices = @transform_0, window_bounds = array<i64: 16, 32>}, {pipeline_mode = #tpu.pipeline_mode<synchronous>, transform_indices = @transform_1, window_bounds = array<i64: 32, 256>}, {pipeline_mode = #tpu.pipeline_mode<synchronous>, transform_indices = @transform_2, window_bounds = array<i64: 1, 256>}, {pipeline_mode = #tpu.pipeline_mode<synchronous>, transform_indices = @transform_3, window_bounds = array<i64: 256, 128>}, {pipeline_mode = #tpu.pipeline_mode<synchronous>, transform_indices = @transform_4, window_bounds = array<i64: 1, 128>}, {pipeline_mode = #tpu.pipeline_mode<synchronous>, transform_indices = @transform_5, window_bounds = array<i64: 128, 128>}, {pipeline_mode = #tpu.pipeline_mode<synchronous>, transform_indices = @transform_6, window_bounds = array<i64: 1, 128>}, {pipeline_mode = #tpu.pipeline_mode<synchronous>, transform_indices = @transform_7, window_bounds = array<i64: 128, 128>}, {pipeline_mode = #tpu.pipeline_mode<synchronous>, transform_indices = @transform_8, window_bounds = array<i64: 1, 128>}, {transform_indices = @transform_9, window_bounds = array<i64: 16, 128>}]} {
    %c0 = arith.constant 0 : index
    %c0_0 = arith.constant 0 : index
    %0 = vector.load %arg1[%c0, %c0_0] : memref<16x32xf32, #tpu.memory_space<vmem>>, vector<16x32xf32>
    %1 = arith.truncf %0 : vector<16x32xf32> to vector<16x32xbf16>
    %c0_1 = arith.constant 0 : index
    %c0_2 = arith.constant 0 : index
    %2 = vector.load %arg2[%c0_1, %c0_2] : memref<32x256xbf16, #tpu.memory_space<vmem>>, vector<32x256xbf16>
    %cst = arith.constant dense<0.000000e+00> : vector<16x256xf32>
    %3 = tpu.matmul %1, %2, %cst {dimension_numbers = #tpu.dot_dimension_numbers<[1], [0], [0], [1], [0, 0, 1, 1], [], []>} : vector<16x32xbf16>, vector<32x256xbf16>, vector<16x256xf32> -> vector<16x256xf32>
    %c0_3 = arith.constant 0 : index
    %c0_4 = arith.constant 0 : index
    %4 = vector.load %arg3[%c0_3, %c0_4] : memref<1x256xf32, #tpu.memory_space<vmem>>, vector<1x256xf32>
    %5 = vector.broadcast %4 : vector<1x256xf32> to vector<16x256xf32>
    %6 = arith.addf %3, %5 : vector<16x256xf32>
    %cst_5 = arith.constant 0.00999999977 : f32
    %7 = vector.broadcast %cst_5 : f32 to vector<16x256xf32>
    %8 = arith.mulf %7, %6 : vector<16x256xf32>
    %9 = arith.maximumf %6, %8 : vector<16x256xf32>
    %10 = arith.truncf %9 : vector<16x256xf32> to vector<16x256xbf16>
    %c0_6 = arith.constant 0 : index
    %c0_7 = arith.constant 0 : index
    %11 = vector.load %arg4[%c0_6, %c0_7] : memref<256x128xbf16, #tpu.memory_space<vmem>>, vector<256x128xbf16>
    %cst_8 = arith.constant dense<0.000000e+00> : vector<16x128xf32>
    %12 = tpu.matmul %10, %11, %cst_8 {dimension_numbers = #tpu.dot_dimension_numbers<[1], [0], [0], [1], [0, 0, 1, 1], [], []>} : vector<16x256xbf16>, vector<256x128xbf16>, vector<16x128xf32> -> vector<16x128xf32>
    %c0_9 = arith.constant 0 : index
    %c0_10 = arith.constant 0 : index
    %13 = vector.load %arg5[%c0_9, %c0_10] : memref<1x128xf32, #tpu.memory_space<vmem>>, vector<1x128xf32>
    %14 = vector.broadcast %13 : vector<1x128xf32> to vector<16x128xf32>
    %15 = arith.addf %12, %14 : vector<16x128xf32>
    %cst_11 = arith.constant 0.00999999977 : f32
    %16 = vector.broadcast %cst_11 : f32 to vector<16x128xf32>
    %17 = arith.mulf %16, %15 : vector<16x128xf32>
    %18 = arith.maximumf %15, %17 : vector<16x128xf32>
    %19 = arith.truncf %18 : vector<16x128xf32> to vector<16x128xbf16>
    %c0_12 = arith.constant 0 : index
    %c0_13 = arith.constant 0 : index
    %20 = vector.load %arg6[%c0_12, %c0_13] : memref<128x128xbf16, #tpu.memory_space<vmem>>, vector<128x128xbf16>
    %cst_14 = arith.constant dense<0.000000e+00> : vector<16x128xf32>
    %21 = tpu.matmul %19, %20, %cst_14 {dimension_numbers = #tpu.dot_dimension_numbers<[1], [0], [0], [1], [0, 0, 1, 1], [], []>} : vector<16x128xbf16>, vector<128x128xbf16>, vector<16x128xf32> -> vector<16x128xf32>
    %c0_15 = arith.constant 0 : index
    %c0_16 = arith.constant 0 : index
    %22 = vector.load %arg7[%c0_15, %c0_16] : memref<1x128xf32, #tpu.memory_space<vmem>>, vector<1x128xf32>
    %23 = vector.broadcast %22 : vector<1x128xf32> to vector<16x128xf32>
    %24 = arith.addf %21, %23 : vector<16x128xf32>
    %cst_17 = arith.constant 0.00999999977 : f32
    %25 = vector.broadcast %cst_17 : f32 to vector<16x128xf32>
    %26 = arith.mulf %25, %24 : vector<16x128xf32>
    %27 = arith.maximumf %24, %26 : vector<16x128xf32>
    %28 = arith.truncf %27 : vector<16x128xf32> to vector<16x128xbf16>
    %c0_18 = arith.constant 0 : index
    %c0_19 = arith.constant 0 : index
    %29 = vector.load %arg8[%c0_18, %c0_19] : memref<128x128xbf16, #tpu.memory_space<vmem>>, vector<128x128xbf16>
    %cst_20 = arith.constant dense<0.000000e+00> : vector<16x128xf32>
    %30 = tpu.matmul %28, %29, %cst_20 {dimension_numbers = #tpu.dot_dimension_numbers<[1], [0], [0], [1], [0, 0, 1, 1], [], []>} : vector<16x128xbf16>, vector<128x128xbf16>, vector<16x128xf32> -> vector<16x128xf32>
    %c0_21 = arith.constant 0 : index
    %c0_22 = arith.constant 0 : index
    %31 = vector.load %arg9[%c0_21, %c0_22] : memref<1x128xf32, #tpu.memory_space<vmem>>, vector<1x128xf32>
    %32 = vector.broadcast %31 : vector<1x128xf32> to vector<16x128xf32>
    %33 = arith.addf %30, %32 : vector<16x128xf32>
    %cst_23 = arith.constant dense<0xFF800000> : vector<16xf32>
    %34 = vector.multi_reduction <maximumf>, %33, %cst_23 [1] : vector<16x128xf32> to vector<16xf32>
    %35 = vector.shape_cast %34 : vector<16xf32> to vector<16x1xf32>
    %36 = vector.broadcast %35 : vector<16x1xf32> to vector<16x128xf32>
    %37 = arith.subf %33, %36 : vector<16x128xf32>
    %38 = math.exp %37 : vector<16x128xf32>
    %cst_24 = arith.constant dense<0.000000e+00> : vector<16xf32>
    %39 = vector.multi_reduction <add>, %38, %cst_24 [1] : vector<16x128xf32> to vector<16xf32>
    %40 = vector.shape_cast %39 : vector<16xf32> to vector<16x1xf32>
    %41 = tpu.reciprocal %40 {approx = true} : vector<16x1xf32> -> vector<16x1xf32>
    %42 = vector.broadcast %41 : vector<16x1xf32> to vector<16x128xf32>
    %43 = arith.mulf %38, %42 : vector<16x128xf32>
    %44 = arith.truncf %43 : vector<16x128xf32> to vector<16x128xbf16>
    %c0_25 = arith.constant 0 : index
    %c0_26 = arith.constant 0 : index
    %45 = vector.load %arg10[%c0_25, %c0_26] : memref<16x128xbf16, #tpu.memory_space<vmem>>, vector<16x128xbf16>
    tpu.vector_store %arg10[%c0_25, %c0_26], %44 {strides = array<i32>} : memref<16x128xbf16, #tpu.memory_space<vmem>>, vector<16x128xbf16>,
    return
  }
  func.func @transform_0(%arg0: i32) -> (i32, i32) {
    %c0_i32 = arith.constant 0 : i32
    %c0_i32_0 = arith.constant 0 : i32
    return %arg0, %c0_i32 : i32, i32
  }
  func.func @transform_1(%arg0: i32) -> (i32, i32) {
    %c0_i32 = arith.constant 0 : i32
    %c0_i32_0 = arith.constant 0 : i32
    %c0_i32_1 = arith.constant 0 : i32
    return %c0_i32, %c0_i32_0 : i32, i32
  }
  func.func @transform_2(%arg0: i32) -> (i32, i32) {
    %c0_i32 = arith.constant 0 : i32
    %c0_i32_0 = arith.constant 0 : i32
    %c0_i32_1 = arith.constant 0 : i32
    return %c0_i32, %c0_i32_0 : i32, i32
  }
  func.func @transform_3(%arg0: i32) -> (i32, i32) {
    %c0_i32 = arith.constant 0 : i32
    %c0_i32_0 = arith.constant 0 : i32
    %c0_i32_1 = arith.constant 0 : i32
    return %c0_i32, %c0_i32_0 : i32, i32
  }
  func.func @transform_4(%arg0: i32) -> (i32, i32) {
    %c0_i32 = arith.constant 0 : i32
    %c0_i32_0 = arith.constant 0 : i32
    %c0_i32_1 = arith.constant 0 : i32
    return %c0_i32, %c0_i32_0 : i32, i32
  }
  func.func @transform_5(%arg0: i32) -> (i32, i32) {
    %c0_i32 = arith.constant 0 : i32
    %c0_i32_0 = arith.constant 0 : i32
    %c0_i32_1 = arith.constant 0 : i32
    return %c0_i32, %c0_i32_0 : i32, i32
  }
  func.func @transform_6(%arg0: i32) -> (i32, i32) {
    %c0_i32 = arith.constant 0 : i32
    %c0_i32_0 = arith.constant 0 : i32
    %c0_i32_1 = arith.constant 0 : i32
    return %c0_i32, %c0_i32_0 : i32, i32
  }
  func.func @transform_7(%arg0: i32) -> (i32, i32) {
    %c0_i32 = arith.constant 0 : i32
    %c0_i32_0 = arith.constant 0 : i32
    %c0_i32_1 = arith.constant 0 : i32
    return %c0_i32, %c0_i32_0 : i32, i32
  }
  func.func @transform_8(%arg0: i32) -> (i32, i32) {
    %c0_i32 = arith.constant 0 : i32
    %c0_i32_0 = arith.constant 0 : i32
    %c0_i32_1 = arith.constant 0 : i32
    return %c0_i32, %c0_i32_0 : i32, i32
  }
  func.func @transform_9(%arg0: i32) -> (i32, i32) {
    %c0_i32 = arith.constant 0 : i32
    %c0_i32_0 = arith.constant 0 : i32
    return %arg0, %c0_i32 : i32, i32
  }
}

</mosaic_0001>

<bundles_post_ra>
// kernel: tpu_custom_call.1
= control target key start
LH: loop header
LB: loop body
LE: loop exit
PB: predicated region body
PF: predicated region fallthrough
CT: control target
= control target key end

     0   :  { %14 = vsyncpa [#allocation3], 0  ;;  %s1069_s0 = inlined_call_operand.hbm [shape: f32[16,32], index: 0, kind: input, shape index: {}]   ;;  %s1070_s1 = inlined_call_operand.hbm [shape: bf16[32,256], index: 1, kind: input, shape index: {}]   ;;  %s1071_s2 = inlined_call_operand.hbm [shape: f32[1,256], index: 2, kind: input, shape index: {}]   ;;  %s1072_s3 = inlined_call_operand.hbm [shape: bf16[256,128], index: 3, kind: input, shape index: {}]   ;;  %s1073_s4 = inlined_call_operand.vmem [shape: f32[1,128], index: 4, kind: input, shape index: {}]   ;;  %s1074_s5 = inlined_call_operand.hbm [shape: bf16[128,128], index: 5, kind: input, shape index: {}]   ;;  %s1075_s6 = inlined_call_operand.vmem [shape: f32[1,128], index: 6, kind: input, shape index: {}]   ;;  %s1076_s7 = inlined_call_operand.hbm [shape: bf16[128,128], index: 7, kind: input, shape index: {}]   ;;  %s1077_s8 = inlined_call_operand.vmem [shape: f32[1,128], index: 8, kind: input, shape index: {}]   ;;  %s1078_s9 = inlined_call_operand.hbm [shape: bf16[16,128], index: 9, kind: output, shape index: {}]  }
   0x1   :  { %15 = vsyncpa [#allocation6], 0 }
   0x2   :  { %16 = vsyncpa [#allocation9], 0 }
   0x3   :  { %17 = vsyncpa [#allocation12], 0 }
   0x4   :  { %18 = vsyncpa [#allocation4], 0  ;;  %s36_s11 = sshll.u32 %s1070_s1, 4  ;;  %s966_s12 = smov [#allocation5]   ;;  %s37_s11 = int_to_ptr.hbm [resolvable:$true] %s36_s11 }
   0x5   :  { %s38_s13 = sshll.u32 %s966_s12, 4  ;;  %s60_s16 = sshll.u32 %s1072_s3, 4  ;;  %s39_s13 = int_to_ptr.vmem [resolvable:$true] %s38_s13  ;;  %s61_s16 = int_to_ptr.hbm [resolvable:$true] %s60_s16 }
   0x6   :  { %s967_s17 = smov 128   ;;  %s968_s18 = smov 8  }
   0x7   :  { %44 = dma.hbm_to_vmem [thread:$0]  %s37_s11, 512, %s39_s13, [#allocation6], %s967_s17, %s967_s17, %s968_s18  }
   0x8   :  { %s969_s19 = smov [#allocation8]   ;;  %s970_s21 = smov 64  }
   0x9   :  { %s62_s20 = sshll.u32 %s969_s19, 4  ;;  %s971_s22 = smov 4   ;;  %s63_s20 = int_to_ptr.vmem [resolvable:$true] %s62_s20 }
   0xa   :  { %68 = dma.hbm_to_vmem [thread:$0]  %s61_s16, 2048, %s63_s20, [#allocation9], %s970_s21, %s970_s21, %s971_s22  }
   0xb   :  { %s23_s24 = sshll.u32 %s1069_s0, 4  ;;  %s972_s25 = smov [#allocation2]   ;;  %s24_s24 = int_to_ptr.hbm [resolvable:$true] %s23_s24 }
   0xc   :  { %s25_s3 = sshll.u32 %s972_s25, 4  ;;  %s50_s28 = sshll.u32 %s1071_s2, 4  ;;  %s26_s3 = int_to_ptr.vmem [resolvable:$true] %s25_s3  ;;  %s51_s28 = int_to_ptr.hbm [resolvable:$true] %s50_s28 }
   0xd   :  { %31 = dma.hbm_to_vmem [thread:$0]  %s24_s24, 256, %s26_s3, [#allocation3], %s967_s17, %s967_s17, %s968_s18  }
   0xe   :  { %s973_s29 = smov [#allocation7]   ;;  %s75_s12 = sshll.u32 %s1074_s5, 4  ;;  %s76_s12 = int_to_ptr.hbm [resolvable:$true] %s75_s12 }
   0xf   :  { %s52_s30 = sshll.u32 %s973_s29, 4  ;;  %s90_s14 = sshll.u32 %s1076_s7, 4  ;;  %s53_s30 = int_to_ptr.vmem [resolvable:$true] %s52_s30  ;;  %s91_s14 = int_to_ptr.hbm [resolvable:$true] %s90_s14 }
  0x10   :  { %55 = dma.hbm_to_vmem [thread:$0]  %s51_s28, 32, %s53_s30, [#allocation6]  }
  0x11   :  { %s974_s15 = smov [#allocation10]   ;;  %s975_s2 = smov [#allocation11]  }
  0x12   :  { %s77_s16 = sshll.u32 %s974_s15, 4  ;;  %s92_s17 = sshll.u32 %s975_s2, 4  ;;  %s78_s16 = int_to_ptr.vmem [resolvable:$true] %s77_s16  ;;  %s93_s17 = int_to_ptr.vmem [resolvable:$true] %s92_s17 }
  0x13   :  { %83 = dma.hbm_to_vmem [thread:$0]  %s76_s12, 1024, %s78_s16, [#allocation9], %s970_s21, %s970_s21, %s971_s22  }
  0x14   :  { %98 = dma.hbm_to_vmem [thread:$0]  %s91_s14, 1024, %s93_s17, [#allocation12], %s970_s21, %s970_s21, %s971_s22  }
  0x15   :  { %956 = dma.done.wait [#allocation3], 256  }
  0x16   :  { %957 = vsyncadd [#allocation3], 4294967040 }
  0x17   :  { %958 = dma.done.wait [#allocation6], 544  }
  0x18   :  { %959 = vsyncadd [#allocation6], 4294966752 }
  0x19   :  { %960 = dma.done.wait [#allocation9], 3072  }
  0x1a   :  { %961 = vsyncadd [#allocation9], 4294964224 }
  0x1b   :  { %962 = dma.done.wait [#allocation12], 1024  }
  0x1c   :  { %963 = vsyncadd [#allocation12], 4294966272  ;;  %v589_v0 = vld [vmem:[#allocation5 + $0x10] sm:$0xf]  ;;  %v728_v1 = vld [vmem:[#allocation5 + $0x14] sm:$0xf0] }
  0x1d   :  { %v727_v2 = vld [vmem:[#allocation5 + $0x14] sm:$0xf]  ;;  %v590_v3 = vor.u32 %v728_v1, %v589_v0  ;;  %v591_v4 = vld [vmem:[#allocation5 + $0x18] sm:$0xf0]  ;;  %v581_v5 = vld [vmem:[#allocation5] sm:$0xf] }
  0x1e   :  { %v726_v6 = vld [vmem:[#allocation5 + $0x4] sm:$0xf0]  ;;  %v594_v7 = vor.u32 %v727_v2, %v591_v4  ;;  %v725_v8 = vld [vmem:[#allocation5 + $0x4] sm:$0xf]  ;;  %v583_v9 = vld [vmem:[#allocation5 + $0x8] sm:$0xf0] }
  0x1f   :  { %v126_v10 = vld [vmem:[#allocation2] sm:$0xff]  ;;  %169 = vmatpush.bf16.msra.mxu0 %v590_v3  ;;  %v582_v11 = vor.u32 %v726_v6, %v581_v5  ;;  %v127_v12 = vld [vmem:[#allocation2 + $0x8] sm:$0xff]  ;;  %v586_v15 = vor.u32 %v725_v8, %v583_v9  ;;  %vm159_vm0 = vcmask 261120   ;;  %v733_v21 = vld [vmem:[#allocation8 + $0x20] sm:$0xff]  ;;  %s563_s24 = sshll.u32 %s1078_s9, 4  ;;  %s564_s24 = int_to_ptr.hbm [resolvable:$true] %s563_s24 }
  0x20   :  { %v736_v13 = vld [vmem:[#allocation8 + $0x38] sm:$0xff]  ;;  %183 = vmatpush.bf16.msra.mxu1 %v594_v7  ;;  %v735_v16 = vld [vmem:[#allocation8 + $0x30] sm:$0xff]  ;;  %v128_v18 = vpack.c.bf16 %v127_v12, %v126_v10  ;;  %v734_v19 = vld [vmem:[#allocation8 + $0x28] sm:$0xff] }
  0x21   :  { %v744_v14 = vld [vmem:[#allocation8 + $0x78] sm:$0xff]  ;;  %333 = vmatpush.bf16.msra.mxu2 %v736_v13  ;;  %v743_v17 = vld [vmem:[#allocation8 + $0x70] sm:$0xff]  ;;  %v742_v20 = vld [vmem:[#allocation8 + $0x68] sm:$0xff] }
  0x22   :  { %347 = vmatpush.bf16.msra.mxu3 %v744_v14  ;;  %v741_v22 = vld [vmem:[#allocation8 + $0x60] sm:$0xff]  ;;  %v732_v23 = vld [vmem:[#allocation8 + $0x18] sm:$0xff]  ;;  %v731_v25 = vld [vmem:[#allocation8 + $0x10] sm:$0xff] }
  0x23   :  { %170 = vmatpush.bf16.msra.mxu0 %v582_v11  ;;  %v740_v24 = vld [vmem:[#allocation8 + $0x58] sm:$0xff]  ;;  %v739_v26 = vld [vmem:[#allocation8 + $0x50] sm:$0xff]  ;;  %v730_v27 = vld [vmem:[#allocation8 + $0x8] sm:$0xff] }
  0x24   :  { %184 = vmatpush.bf16.msra.mxu1 %v586_v15  ;;  %v738_v28 = vld [vmem:[#allocation8 + $0x48] sm:$0xff]  ;;  %v729_v29 = vld [vmem:[#allocation8] sm:$0xff]  ;;  %v752_v31 = vld [vmem:[#allocation10 + $0x38] sm:$0xff] }
  0x25   :  { %334 = vmatpush.bf16.msra.mxu2 %v735_v16  ;;  %v737_v30 = vld [vmem:[#allocation8 + $0x40] sm:$0xff]  ;;  %v751_v32 = vld [vmem:[#allocation10 + $0x30] sm:$0xff]  ;;  %v750_v33 = vld [vmem:[#allocation10 + $0x28] sm:$0xff] }
  0x26   :  { %348 = vmatpush.bf16.msra.mxu3 %v743_v17  ;;  %595 = vmatmul.msk.bf16.vlgmr.msra.gmra.mxu0 %vm159_vm0, %v128_v18  ;;  %v133_v34 = vld [vmem:[#allocation7] sm:$0x3]  ;;  %v749_v55 = vld [vmem:[#allocation10 + $0x20] sm:$0xff]  ;;  %v747_v57 = vld [vmem:[#allocation10 + $0x10] sm:$0xff] }
  0x27   :  { %596 = vmatmul.msk.bf16.vlgmr.msra.gmra.mxu1 %vm159_vm0, %v128_v18  ;;  %434 = vmatpush.bf16.msrb.mxu0 %v752_v31  ;;  %v135_v36 = vperm.slane %v133_v34, 0  ;;  %v136_v38 = vperm.slane %v133_v34, 1  ;;  %v748_v56 = vld [vmem:[#allocation10 + $0x18] sm:$0xff]  ;;  %v746_v58 = vld [vmem:[#allocation10 + $0x8] sm:$0xff]  ;;  %v745_v59 = vld [vmem:[#allocation10] sm:$0xff] }
  0x28   :  { %v760_v60 = vld [vmem:[#allocation11 + $0x38] sm:$0xff]  ;;  %v759_v61 = vld [vmem:[#allocation11 + $0x30] sm:$0xff]  ;;  %v758_v62 = vld [vmem:[#allocation11 + $0x28] sm:$0xff] }
  0x29   :  { %335 = vmatpush.bf16.msra.mxu2 %v734_v19  ;;  %521 = vmatpush.bf16.msrb.mxu1 %v760_v60  ;;  %v757_v63 = vld [vmem:[#allocation11 + $0x20] sm:$0xff]  ;;  %v777_v0 = vld [vmem:[%s1073_s4] ss:$0 sm:$0xff]  ;;  %v756_v14 = vld [vmem:[#allocation11 + $0x18] sm:$0xff] }
  0x2a   :  { %349 = vmatpush.bf16.msra.mxu3 %v742_v20  ;;  %v755_v15 = vld [vmem:[#allocation11 + $0x10] sm:$0xff]  ;;  %v754_v16 = vld [vmem:[#allocation11 + $0x8] sm:$0xff]  ;;  %v753_v17 = vld [vmem:[#allocation11] sm:$0xff] }
  0x2b   :  { %435 = vmatpush.bf16.msrb.mxu0 %v751_v32  ;;  %v778_v19 = vld [vmem:[%s1075_s6] ss:$0 sm:$0xff]  ;;  %s976_s6 = smov [#allocation13]  }
  0x2d   :  { %336 = vmatpush.bf16.msra.mxu2 %v733_v21  ;;  %522 = vmatpush.bf16.msrb.mxu1 %v759_v61 }
  0x2e   :  { %350 = vmatpush.bf16.msra.mxu3 %v741_v22 }
  0x2f   :  { %436 = vmatpush.bf16.msrb.mxu0 %v750_v33 }
  0x31   :  { %337 = vmatpush.bf16.msra.mxu2 %v732_v23  ;;  %523 = vmatpush.bf16.msrb.mxu1 %v758_v62 }
  0x32   :  { %351 = vmatpush.bf16.msra.mxu3 %v740_v24 }
  0x33   :  { %437 = vmatpush.bf16.msrb.mxu0 %v749_v55 }
  0x35   :  { %338 = vmatpush.bf16.msra.mxu2 %v731_v25  ;;  %524 = vmatpush.bf16.msrb.mxu1 %v757_v63 }
  0x36   :  { %352 = vmatpush.bf16.msra.mxu3 %v739_v26 }
  0x37   :  { %438 = vmatpush.bf16.msrb.mxu0 %v748_v56 }
  0x39   :  { %339 = vmatpush.bf16.msra.mxu2 %v730_v27  ;;  %525 = vmatpush.bf16.msrb.mxu1 %v756_v14 }
  0x3a   :  { %353 = vmatpush.bf16.msra.mxu3 %v738_v28  ;;  %v779_v28 = vld [vmem:[%s1077_s8] ss:$0 sm:$0xff]  ;;  %s561_s8 = sshll.u32 %s976_s6, 4  ;;  %s562_s8 = int_to_ptr.vmem [resolvable:$true] %s561_s8 }
  0x3b   :  { %439 = vmatpush.bf16.msrb.mxu0 %v747_v57 }
  0x3d   :  { %340 = vmatpush.bf16.msra.mxu2 %v729_v29  ;;  %526 = vmatpush.bf16.msrb.mxu1 %v755_v15 }
  0x3e   :  { %354 = vmatpush.bf16.msra.mxu3 %v737_v30 }
  0x3f   :  { %440 = vmatpush.bf16.msrb.mxu0 %v746_v58 }
  0x41   :  { %527 = vmatpush.bf16.msrb.mxu1 %v754_v16 }
  0x43   :  { %441 = vmatpush.bf16.msrb.mxu0 %v745_v59 }
  0x45   :  { %528 = vmatpush.bf16.msrb.mxu1 %v753_v17 }
  0xa3   :  { %v172_v35 = vpop.f32.mrf.mxu0 }
  0xa4   :  { %v186_v37 = vpop.f32.mrf.mxu1  ;;  %v173_v39 = vadd.f32 %v172_v35, %v135_v36 }
  0xa5   :  { %v187_v40 = vadd.f32 %v186_v37, %v136_v38 }
  0xa6   :  { %v191_v42 = vmul.f32 0.01, %v173_v39 }
  0xa7   :  { %v192_v45 = vmul.f32 0.01, %v187_v40 }
  0xa8   :  { %v195_v49 = vmax.f32 %v173_v39, %v191_v42 }
  0xa9   :  { %v196_v51 = vmax.f32 %v187_v40, %v192_v45 }
  0xab   :  { %v174_v41 = vpop.f32.mrf.mxu0 }
  0xac   :  { %v175_v43 = vadd.f32 %v174_v41, %v135_v36  ;;  %v188_v44 = vpop.f32.mrf.mxu1 }
  0xad   :  { %v189_v46 = vadd.f32 %v188_v44, %v136_v38 }
  0xae   :  { %v193_v47 = vmul.f32 0.01, %v175_v43 }
  0xaf   :  { %v194_v48 = vmul.f32 0.01, %v189_v46 }
  0xb0   :  { %v197_v50 = vmax.f32 %v175_v43, %v193_v47 }
  0xb1   :  { %v198_v52 = vmax.f32 %v189_v46, %v194_v48 }
  0xb2   :  { %v199_v53 = vpack.c.bf16 %v197_v50, %v195_v49 }
  0xb3   :  { %v200_v54 = vpack.c.bf16 %v198_v52, %v196_v51 }
  0xb4   :  { %341 = vmatmul.bf16.vlgmr.msra.gmra.mxu2 %v199_v53 }
  0xb5   :  { %355 = vmatmul.bf16.vlgmr.msra.gmra.mxu3 %v200_v54 }
 0x137   :  { %v342_v1 = vpop.f32.mrf.mxu2 }
 0x138   :  { %v356_v2 = vpop.f32.mrf.mxu3  ;;  %v343_v3 = vadd.f32 %v777_v0, %v342_v1 }
 0x13a   :  { %v357_v4 = vadd.f32 %v356_v2, %v343_v3 }
 0x13c   :  { %v361_v8 = vmul.f32 0.01, %v357_v4 }
 0x13e   :  { %v363_v11 = vmax.f32 %v357_v4, %v361_v8 }
 0x13f   :  { %v344_v5 = vpop.f32.mrf.mxu2 }
 0x140   :  { %v345_v6 = vadd.f32 %v777_v0, %v344_v5  ;;  %v358_v7 = vpop.f32.mrf.mxu3 }
 0x142   :  { %v359_v9 = vadd.f32 %v358_v7, %v345_v6 }
 0x144   :  { %v362_v10 = vmul.f32 0.01, %v359_v9 }
 0x146   :  { %v364_v12 = vmax.f32 %v359_v9, %v362_v10 }
 0x148   :  { %v365_v13 = vpack.c.bf16 %v364_v12, %v363_v11 }
 0x14a   :  { %442 = vmatmul.bf16.vlgmr.msrb.gmra.mxu0 %v365_v13 }
 0x1c7   :  { %v443_v18 = vpop.f32.mrf.mxu0 }
 0x1c8   :  { %v444_v20 = vadd.f32 %v778_v19, %v443_v18 }
 0x1ca   :  { %v448_v22 = vmul.f32 0.01, %v444_v20 }
 0x1cc   :  { %v450_v25 = vmax.f32 %v444_v20, %v448_v22 }
 0x1cf   :  { %v445_v21 = vpop.f32.mrf.mxu0 }
 0x1d0   :  { %v446_v23 = vadd.f32 %v778_v19, %v445_v21 }
 0x1d2   :  { %v449_v24 = vmul.f32 0.01, %v446_v23 }
 0x1d4   :  { %v451_v26 = vmax.f32 %v446_v23, %v449_v24 }
 0x1d6   :  { %v452_v27 = vpack.c.bf16 %v451_v26, %v450_v25 }
 0x1d8   :  { %529 = vmatmul.bf16.vlgmr.msrb.gmra.mxu1 %v452_v27 }
 0x255   :  { %v530_v29 = vpop.f32.mrf.mxu1 }
 0x256   :  { %v531_v30 = vadd.f32 %v779_v28, %v530_v29 }
 0x258   :  { %535 = vmax.xlane.f32.xlu0 %v531_v30 }
 0x25d   :  { %v532_v31 = vpop.f32.mrf.mxu1 }
 0x25e   :  { %v533_v32 = vadd.f32 %v779_v28, %v532_v31 }
 0x260   :  { %537 = vmax.xlane.f32.xlu0 %v533_v32 }
 0x2cb   :  { %v536_v33 = vpop.xlane.xlu0 %535 }
 0x2cc   :  { %v539_v34 = vsub.f32 %v531_v30, %v536_v33 }
 0x2ce   :  { %v541_v35 = vmul.f32 1.442695, %v539_v34 }
 0x2d0   :  { %780 = vpow2.f32 %v541_v35 }
 0x2d3   :  { %v538_v36 = vpop.xlane.xlu0 %537 }
 0x2d4   :  { %v540_v37 = vsub.f32 %v533_v32, %v538_v36 }
 0x2d6   :  { %v781_v38 = vpop.eup %780  ;;  %v543_v39 = vmul.f32 1.442695, %v540_v37 }
 0x2d7   :  { %545 = vadd.xlane.f32.xlu1 %v781_v38 }
 0x2d8   :  { %782 = vpow2.f32 %v543_v39 }
 0x2de   :  { %v783_v40 = vpop.eup %782 }
 0x2df   :  { %547 = vadd.xlane.f32.xlu1 %v783_v40 }
 0x34a   :  { %v546_v41 = vpop.xlane.xlu1 %545 }
 0x34b   :  { %784 = vrcp.f32 %v546_v41 }
 0x351   :  { %v785_v43 = vpop.eup %784 }
 0x352   :  { %v548_v42 = vpop.xlane.xlu1 %547  ;;  %v551_v46 = vmul.f32 %v785_v43, %v781_v38 }
 0x353   :  { %786 = vrcp.f32 %v548_v42 }
 0x359   :  { %v787_v44 = vpop.eup %786 }
 0x35a   :  { %v552_v45 = vmul.f32 %v787_v44, %v783_v40 }
 0x35c   :  { %v764_v47 = vpack.c.bf16 %v552_v45, %v551_v46 }
 0x35e   :  { %765 = vst [vmem:[#allocation13] sm:$0xff] %v764_v47  }
 0x35f   :  { %569 = dma.vmem_to_hbm [thread:$0]  %s562_s8, 128, %s564_s24, [#allocation4], %s970_s21, %s970_s21, %s971_s22  }
 0x360   :  { %964 = dma.done.wait [#allocation4], 128  }
 0x361   :  { %965 = vsyncadd [#allocation4], 4294967168 }
 0x362   :  { %574 = vsyncpa [#allocation3], 1 }
 0x363   :  { %575 = vsyncpa [#allocation6], 1 }
 0x364   :  { %576 = vsyncpa [#allocation9], 1 }
 0x365   :  { %577 = vsyncpa [#allocation12], 1 }
 0x366   :  { %578 = vsyncpa [#allocation4], 1 }

</bundles_post_ra>
